<compile_context>
chip_gen: v7x
topology: tpu7x:2x2x1
jax: 0.10.0
libtpu: 0.0.40
codegen_flags: <defaults>
</compile_context>

<pallas_src>
import jax
import jax.numpy as jnp
from jax import lax
from jax.experimental import pallas as pl
from jax.experimental.pallas import tpu as pltpu


def _round_up(x, m):
    return ((x + m - 1) // m) * m


def _cdiv(a, b):
    return -(-a // b)


def _make_sc_kernel(m, k, tile_m, needs_mask):
    """Builds the accumulate-and-finalize kernel (all sizes are static)."""

    def kernel(x_ref, y_ref, sd_out, sy_out, sd_acc, sy_acc):
        i = pl.program_id(0)

        @pl.when(i == 0)
        def _init():
            sd_acc[...] = jnp.zeros_like(sd_acc)
            sy_acc[...] = jnp.zeros_like(sy_acc)

        x = x_ref[...].astype(jnp.float32)      # (tile_m, K)
        y = y_ref[...].astype(jnp.float32)      # (tile_m, K)
        d = y - x
        sq_d = d * d
        sq_y = y * y

        if needs_mask:
            # Tail tile: rows past M are undefined — zero them out.
            row = lax.broadcasted_iota(jnp.int32, (tile_m, k), 0)
            valid = (i * tile_m + row) < m
            sq_d = jnp.where(valid, sq_d, 0.0)
            sq_y = jnp.where(valid, sq_y, 0.0)

        if tile_m % 8 == 0:
            # Layout-preserving fold of the sublane-major axis (pure VPU adds).
            r = tile_m // 8
            sd_acc[...] += jnp.sum(sq_d.reshape(r, 8, k), axis=0)
            sy_acc[...] += jnp.sum(sq_y.reshape(r, 8, k), axis=0)
        else:                                    # tiny-M fallback (tile_m == M < 8)
            sd_acc[...] += sq_d
            sy_acc[...] += sq_y

        @pl.when(i == pl.num_programs(0) - 1)
        def _finish():
            sd_out[...] = jnp.sum(
                jnp.sum(sd_acc[...], axis=1, keepdims=True), axis=0, keepdims=True)
            sy_out[...] = jnp.sum(
                jnp.sum(sy_acc[...], axis=1, keepdims=True), axis=0, keepdims=True)

    return kernel


def spectral_convergence_loss(x_mag, y_mag):
    """||y_mag - x_mag||_F / ||y_mag||_F  (Frobenius norm over all elements)."""
    x = jnp.asarray(x_mag)
    y = jnp.asarray(y_mag)
    assert x.shape == y.shape, "x_mag and y_mag must have the same shape"

    # Keep bf16/f32 inputs as-is (bandwidth win for bf16); otherwise go to f32.
    if x.dtype != y.dtype or x.dtype not in (jnp.bfloat16, jnp.float32):
        x = x.astype(jnp.float32)
        y = y.astype(jnp.float32)

    # Flatten to (M, K) with frequency bins on the lane axis (no padding).
    k = int(x.shape[-1]) if x.ndim >= 1 else 1
    m = 1
    for d in x.shape[:-1]:
        m *= int(d)
    m = max(int(m), 1)
    x2 = x.reshape(m, k)
    y2 = y.reshape(m, k)

    # Byte-budget tile sizing: ~6 MiB of VMEM per input block.
    itemsize = jnp.dtype(x.dtype).itemsize
    kp_internal = _round_up(k, 128)                 # internal VMEM lane padding
    row_bytes = kp_internal * itemsize
    target_block_bytes = 6 << 20
    budget_rows = max((target_block_bytes // row_bytes) // 8 * 8, 8)
    if m >= 8:
        tile_m = int(min(budget_rows, (m // 8) * 8))
    else:
        tile_m = m                                   # block == full row extent
    steps = _cdiv(m, tile_m)
    needs_mask = (m % tile_m) != 0
    acc_rows = 8 if tile_m % 8 == 0 else tile_m

    # 2 inputs x 2 pipeline buffers + scratch accumulators + headroom.
    vmem_needed = 4 * tile_m * row_bytes + 2 * acc_rows * kp_internal * 4 + (1 << 20)
    vmem_limit = int(min(max(vmem_needed + (4 << 20), 16 << 20), 100 << 20))

    kernel = _make_sc_kernel(m, k, tile_m, needs_mask)

    sd, sy = pl.pallas_call(
        kernel,
        out_shape=[jax.ShapeDtypeStruct((1, 1), jnp.float32)] * 2,
        grid_spec=pltpu.PrefetchScalarGridSpec(
            num_scalar_prefetch=0,
            grid=(steps,),
            in_specs=[
                pl.BlockSpec((tile_m, k), lambda i: (i, 0)),
                pl.BlockSpec((tile_m, k), lambda i: (i, 0)),
            ],
            out_specs=[pl.BlockSpec((1, 1), lambda i: (0, 0))] * 2,
            scratch_shapes=[pltpu.VMEM((acc_rows, k), jnp.float32)] * 2,
        ),
        compiler_params=pltpu.CompilerParams(
            dimension_semantics=("arbitrary",),
            vmem_limit_bytes=vmem_limit,
        ),
    )(x2, y2)

    return jnp.sqrt(sd[0, 0]) / jnp.sqrt(sy[0, 0])


if __name__ == "__main__":
    # Magnitude spectrograms (batch, n_frames, n_bins), e.g. n_fft=128 -> 65 bins.
    key = jax.random.PRNGKey(0)
    k1, k2, k3, k4 = jax.random.split(key, 4)

    # Case 1: rows divide evenly (no tail mask).
    B, F, K = 2, 24, 65
    y_mag = jnp.abs(jax.random.normal(k1, (B, F, K), dtype=jnp.float32)) + 0.1
    x_mag = jnp.abs(y_mag + 0.1 * jax.random.normal(k2, (B, F, K), dtype=jnp.float32))
    loss1 = jax.block_until_ready(spectral_convergence_loss(x_mag, y_mag))
    ref1 = jax.block_until_ready(jnp.linalg.norm(y_mag - x_mag) / jnp.linalg.norm(y_mag))
    assert loss1.shape == () and bool(jnp.isfinite(loss1))
    assert abs(float(loss1) - float(ref1)) <= 1e-5 * max(1.0, abs(float(ref1))), (
        float(loss1), float(ref1))

    # Case 2: ragged row count (exercises the in-kernel tail mask + multi-step grid).
    B2, F2, K2 = 3, 17, 65
    y2 = jnp.abs(jax.random.normal(k3, (B2, F2, K2), dtype=jnp.float32)) + 0.1
    x2 = jnp.abs(y2 + 0.1 * jax.random.normal(k4, (B2, F2, K2), dtype=jnp.float32))
    loss2 = jax.block_until_ready(spectral_convergence_loss(x2, y2))
    ref2 = jax.block_until_ready(jnp.linalg.norm(y2 - x2) / jnp.linalg.norm(y2))
    assert loss2.shape == () and bool(jnp.isfinite(loss2))
    assert abs(float(loss2) - float(ref2)) <= 1e-5 * max(1.0, abs(float(ref2))), (
        float(loss2), float(ref2))

    print("KERNEL_OK")
</pallas_src>

<mosaic_0001>
module attributes {stable_mosaic.version = 11 : i64} {
  func.func @kernel(%arg0: i32, %arg1: memref<48x65xf32, #tpu.memory_space<vmem>>, %arg2: memref<48x65xf32, #tpu.memory_space<vmem>>, %arg3: memref<1x1xf32, #tpu.memory_space<vmem>>, %arg4: memref<1x1xf32, #tpu.memory_space<vmem>>, %arg5: memref<8x65xf32, #tpu.memory_space<vmem>>, %arg6: memref<8x65xf32, #tpu.memory_space<vmem>>) attributes {dimension_semantics = [#tpu.dimension_semantics<arbitrary>], iteration_bounds = array<i64: 1>, scalar_prefetch = 0 : i64, scratch_operands = 2 : i64, tpu.core_type = #tpu.core_type<tc>, window_params = [{transform_indices = @transform_0, window_bounds = array<i64: 48, 65>}, {transform_indices = @transform_1, window_bounds = array<i64: 48, 65>}, {pipeline_mode = #tpu.pipeline_mode<synchronous>, transform_indices = @transform_2, window_bounds = array<i64: 1, 1>}, {pipeline_mode = #tpu.pipeline_mode<synchronous>, transform_indices = @transform_3, window_bounds = array<i64: 1, 1>}]} {
    %c0_i32 = arith.constant 0 : i32
    %0 = arith.cmpi eq, %arg0, %c0_i32 : i32
    %1 = arith.extui %0 : i1 to i32
    %c0_i32_0 = arith.constant 0 : i32
    %2 = arith.cmpi ne, %1, %c0_i32_0 : i32
    scf.if %2 {
      %cst_15 = arith.constant 0.000000e+00 : f32
      %21 = vector.broadcast %cst_15 : f32 to vector<8x65xf32>
      %c0_16 = arith.constant 0 : index
      %c0_17 = arith.constant 0 : index
      %22 = vector.load %arg5[%c0_16, %c0_17] : memref<8x65xf32, #tpu.memory_space<vmem>>, vector<8x65xf32>
      tpu.vector_store %arg5[%c0_16, %c0_17], %21 {strides = array<i32>} : memref<8x65xf32, #tpu.memory_space<vmem>>, vector<8x65xf32>,
      %cst_18 = arith.constant 0.000000e+00 : f32
      %23 = vector.broadcast %cst_18 : f32 to vector<8x65xf32>
      %c0_19 = arith.constant 0 : index
      %c0_20 = arith.constant 0 : index
      %24 = vector.load %arg6[%c0_19, %c0_20] : memref<8x65xf32, #tpu.memory_space<vmem>>, vector<8x65xf32>
      tpu.vector_store %arg6[%c0_19, %c0_20], %23 {strides = array<i32>} : memref<8x65xf32, #tpu.memory_space<vmem>>, vector<8x65xf32>,
    } else {
    }
    %c0 = arith.constant 0 : index
    %c0_1 = arith.constant 0 : index
    %3 = vector.load %arg1[%c0, %c0_1] : memref<48x65xf32, #tpu.memory_space<vmem>>, vector<48x65xf32>
    %c0_2 = arith.constant 0 : index
    %c0_3 = arith.constant 0 : index
    %4 = vector.load %arg2[%c0_2, %c0_3] : memref<48x65xf32, #tpu.memory_space<vmem>>, vector<48x65xf32>
    %5 = arith.subf %4, %3 : vector<48x65xf32>
    %6 = arith.mulf %5, %5 : vector<48x65xf32>
    %7 = arith.mulf %4, %4 : vector<48x65xf32>
    %c0_4 = arith.constant 0 : index
    %c0_5 = arith.constant 0 : index
    %8 = vector.load %arg5[%c0_4, %c0_5] : memref<8x65xf32, #tpu.memory_space<vmem>>, vector<8x65xf32>
    %9 = vector.shape_cast %6 : vector<48x65xf32> to vector<6x8x65xf32>
    %cst = arith.constant dense<0.000000e+00> : vector<8x65xf32>
    %10 = vector.multi_reduction <add>, %9, %cst [0] : vector<6x8x65xf32> to vector<8x65xf32>
    %11 = arith.addf %8, %10 : vector<8x65xf32>
    %c0_6 = arith.constant 0 : index
    %c0_7 = arith.constant 0 : index
    %12 = vector.load %arg5[%c0_6, %c0_7] : memref<8x65xf32, #tpu.memory_space<vmem>>, vector<8x65xf32>
    tpu.vector_store %arg5[%c0_6, %c0_7], %11 {strides = array<i32>} : memref<8x65xf32, #tpu.memory_space<vmem>>, vector<8x65xf32>,
    %c0_8 = arith.constant 0 : index
    %c0_9 = arith.constant 0 : index
    %13 = vector.load %arg6[%c0_8, %c0_9] : memref<8x65xf32, #tpu.memory_space<vmem>>, vector<8x65xf32>
    %14 = vector.shape_cast %7 : vector<48x65xf32> to vector<6x8x65xf32>
    %cst_10 = arith.constant dense<0.000000e+00> : vector<8x65xf32>
    %15 = vector.multi_reduction <add>, %14, %cst_10 [0] : vector<6x8x65xf32> to vector<8x65xf32>
    %16 = arith.addf %13, %15 : vector<8x65xf32>
    %c0_11 = arith.constant 0 : index
    %c0_12 = arith.constant 0 : index
    %17 = vector.load %arg6[%c0_11, %c0_12] : memref<8x65xf32, #tpu.memory_space<vmem>>, vector<8x65xf32>
    tpu.vector_store %arg6[%c0_11, %c0_12], %16 {strides = array<i32>} : memref<8x65xf32, #tpu.memory_space<vmem>>, vector<8x65xf32>,
    %c0_i32_13 = arith.constant 0 : i32
    %18 = arith.cmpi eq, %arg0, %c0_i32_13 : i32
    %19 = arith.extui %18 : i1 to i32
    %c0_i32_14 = arith.constant 0 : i32
    %20 = arith.cmpi ne, %19, %c0_i32_14 : i32
    scf.if %20 {
      %c0_15 = arith.constant 0 : index
      %c0_16 = arith.constant 0 : index
      %21 = vector.load %arg5[%c0_15, %c0_16] : memref<8x65xf32, #tpu.memory_space<vmem>>, vector<8x65xf32>
      %cst_17 = arith.constant dense<0.000000e+00> : vector<8xf32>
      %22 = vector.multi_reduction <add>, %21, %cst_17 [1] : vector<8x65xf32> to vector<8xf32>
      %23 = vector.shape_cast %22 : vector<8xf32> to vector<8x1xf32>
      %cst_18 = arith.constant dense<0.000000e+00> : vector<1xf32>
      %24 = vector.multi_reduction <add>, %23, %cst_18 [0] : vector<8x1xf32> to vector<1xf32>
      %25 = vector.shape_cast %24 : vector<1xf32> to vector<1x1xf32>
      %c0_19 = arith.constant 0 : index
      %c0_20 = arith.constant 0 : index
      %26 = vector.load %arg3[%c0_19, %c0_20] : memref<1x1xf32, #tpu.memory_space<vmem>>, vector<1x1xf32>
      tpu.vector_store %arg3[%c0_19, %c0_20], %25 {strides = array<i32>} : memref<1x1xf32, #tpu.memory_space<vmem>>, vector<1x1xf32>,
      %c0_21 = arith.constant 0 : index
      %c0_22 = arith.constant 0 : index
      %27 = vector.load %arg6[%c0_21, %c0_22] : memref<8x65xf32, #tpu.memory_space<vmem>>, vector<8x65xf32>
      %cst_23 = arith.constant dense<0.000000e+00> : vector<8xf32>
      %28 = vector.multi_reduction <add>, %27, %cst_23 [1] : vector<8x65xf32> to vector<8xf32>
      %29 = vector.shape_cast %28 : vector<8xf32> to vector<8x1xf32>
      %cst_24 = arith.constant dense<0.000000e+00> : vector<1xf32>
      %30 = vector.multi_reduction <add>, %29, %cst_24 [0] : vector<8x1xf32> to vector<1xf32>
      %31 = vector.shape_cast %30 : vector<1xf32> to vector<1x1xf32>
      %c0_25 = arith.constant 0 : index
      %c0_26 = arith.constant 0 : index
      %32 = vector.load %arg4[%c0_25, %c0_26] : memref<1x1xf32, #tpu.memory_space<vmem>>, vector<1x1xf32>
      tpu.vector_store %arg4[%c0_25, %c0_26], %31 {strides = array<i32>} : memref<1x1xf32, #tpu.memory_space<vmem>>, vector<1x1xf32>,
    } else {
    }
    return
  }
  func.func @transform_0(%arg0: i32) -> (i32, i32) {
    %c0_i32 = arith.constant 0 : i32
    %c0_i32_0 = arith.constant 0 : i32
    return %arg0, %c0_i32 : i32, i32
  }
  func.func @transform_1(%arg0: i32) -> (i32, i32) {
    %c0_i32 = arith.constant 0 : i32
    %c0_i32_0 = arith.constant 0 : i32
    return %arg0, %c0_i32 : i32, i32
  }
  func.func @transform_2(%arg0: i32) -> (i32, i32) {
    %c0_i32 = arith.constant 0 : i32
    %c0_i32_0 = arith.constant 0 : i32
    %c0_i32_1 = arith.constant 0 : i32
    return %c0_i32, %c0_i32_0 : i32, i32
  }
  func.func @transform_3(%arg0: i32) -> (i32, i32) {
    %c0_i32 = arith.constant 0 : i32
    %c0_i32_0 = arith.constant 0 : i32
    %c0_i32_1 = arith.constant 0 : i32
    return %c0_i32, %c0_i32_0 : i32, i32
  }
}

</mosaic_0001>

<bundles_post_ra>
// kernel: tpu_custom_call.1
= control target key start
LH: loop header
LB: loop body
LE: loop exit
PB: predicated region body
PF: predicated region fallthrough
CT: control target
= control target key end

     0   :  { %9 = vsyncpa [#allocation5], 0  ;;  %s363_s0 = inlined_call_operand.hbm [shape: f32[48,65], index: 0, kind: input, shape index: {}]   ;;  %s364_s1 = inlined_call_operand.hbm [shape: f32[48,65], index: 1, kind: input, shape index: {}]   ;;  %s365_s2 = inlined_call_operand.hbm [shape: f32[1,1], index: 2, kind: output, shape index: {0}]   ;;  %s366_s3 = inlined_call_operand.hbm [shape: f32[1,1], index: 3, kind: output, shape index: {1}]  }
   0x1   :  { %10 = vsyncpa [#allocation8], 0 }
   0x2   :  { %11 = vsyncpa [#allocation6], 0 }
   0x3   :  { %12 = vsyncpa [#allocation11], 0  ;;  %s268_s12 = smov [#allocation4]   ;;  %s172_s16 = scalar_lea.hbm %s363_s0, 768 }
   0x4   :  { %s18_s13 = sshll.u32 %s268_s12, 4  ;;  %p173_p0 = scmp.ne.s32.totalorder %s363_s0, %s172_s16  ;;  %s19_s13 = int_to_ptr.vmem [resolvable:$true] %s18_s13 }
   0x5   :  { %p176_p1 = scmp.lt.u32.totalorder %s172_s16, %s363_s0 }
   0x7   :  { %p178_p2 = pnand %p176_p1, %p173_p0 }
   0x9   :  { %181 = shalt.err (!%p178_p2)
}
   0xa   :  { %s182_s21 = scalar_lea.vmem %s19_s13, 768  ;;  %p187_p4 = scmp.lt.s32.totalorder %s19_s13, %s19_s13 }
   0xb   :  { %p183_p3 = scmp.ne.s32.totalorder %s19_s13, %s182_s21  ;;  %p188_p5 = scmp.lt.s32.totalorder %s182_s21, %s182_s21 }
   0xd   :  { %p189_p6 = por %p188_p5, %p187_p4 }
   0xf   :  { %p190_p7 = pnand %p189_p6, %p183_p3 }
  0x11   :  { %193 = shalt.err (!%p190_p7)
}
  0x12   :  { %s269_s22 = smov 128   ;;  %s270_s23 = smov 8  }
  0x13   :  { %24 = dma.hbm_to_vmem [thread:$0]  %s363_s0, 768, %s19_s13, [#allocation5], %s269_s22, %s269_s22, %s270_s23  }
  0x14   :  { %s271_s26 = smov [#allocation7]   ;;  %s194_s30 = scalar_lea.hbm %s364_s1, 768 }
  0x15   :  { %s30_s27 = sshll.u32 %s271_s26, 4  ;;  %p195_p8 = scmp.ne.s32.totalorder %s364_s1, %s194_s30  ;;  %s31_s27 = int_to_ptr.vmem [resolvable:$true] %s30_s27 }
  0x16   :  { %p198_p9 = scmp.lt.u32.totalorder %s194_s30, %s364_s1 }
  0x18   :  { %p200_p10 = pnand %p198_p9, %p195_p8 }
  0x1a   :  { %203 = shalt.err (!%p200_p10)
}
  0x1b   :  { %s204_s8 = scalar_lea.vmem %s31_s27, 768  ;;  %p209_p12 = scmp.lt.s32.totalorder %s31_s27, %s31_s27 }
  0x1c   :  { %p205_p11 = scmp.ne.s32.totalorder %s31_s27, %s204_s8  ;;  %p210_p13 = scmp.lt.s32.totalorder %s204_s8, %s204_s8 }
  0x1e   :  { %p211_p0 = por %p210_p13, %p209_p12 }
  0x20   :  { %p212_p1 = pnand %p211_p0, %p205_p11 }
  0x22   :  { %215 = shalt.err (!%p212_p1)
}
  0x23   :  { %36 = dma.hbm_to_vmem [thread:$0]  %s364_s1, 768, %s31_s27, [#allocation8], %s269_s22, %s269_s22, %s270_s23  }
  0x24   :  { %260 = dma.done.wait [#allocation5], 768  }
  0x25   :  { %261 = vsyncadd [#allocation5], 4294966528 }
  0x26   :  { %262 = dma.done.wait [#allocation8], 768  }
  0x27   :  { %263 = vsyncadd [#allocation8], 4294966528  ;;  %vm47_vm0 = vcmask 531456   ;;  %v272_v0 = vmov 0.0   ;;  %v50_v1 = vld [vmem:[#allocation4] sm:$0xff]  ;;  %v51_v2 = vld [vmem:[#allocation4 + $0x8] sm:$0xff] }
  0x28   :  { %48 = vst.msk [vmem:[#allocation2] sm:$0xff] %vm47_vm0, %v272_v0  ;;  %49 = vst.msk [vmem:[#allocation3] sm:$0xff] %vm47_vm0, %v272_v0  ;;  %v52_v3 = vld [vmem:[#allocation4 + $0x10] sm:$0xff]  ;;  %v53_v4 = vld [vmem:[#allocation4 + $0x18] sm:$0xff]  ;;  %s273_s1 = smov [#allocation9]   ;;  %vm122_vm1 = vcmask 0  }
  0x29   :  { %v54_v5 = vld [vmem:[#allocation4 + $0x20] sm:$0xff]  ;;  %v55_v6 = vld [vmem:[#allocation4 + $0x28] sm:$0xff]  ;;  %v56_v7 = vld [vmem:[#allocation7] sm:$0xff]  ;;  %s141_s10 = sshll.u32 %s273_s1, 4  ;;  %s274_s11 = smov [#allocation10]   ;;  %s142_s10 = int_to_ptr.vmem [resolvable:$true] %s141_s10 }
  0x2a   :  { %v57_v8 = vld [vmem:[#allocation7 + $0x8] sm:$0xff]  ;;  %v58_v9 = vld [vmem:[#allocation7 + $0x10] sm:$0xff]  ;;  %v59_v10 = vld [vmem:[#allocation7 + $0x18] sm:$0xff]  ;;  %v62_v13 = vsub.f32 %v56_v7, %v50_v1  ;;  %v74_v16 = vmul.f32 %v56_v7, %v56_v7  ;;  %s151_s12 = sshll.u32 %s274_s11, 4  ;;  %s216_s13 = scalar_lea.vmem %s142_s10, 16  ;;  %s152_s12 = int_to_ptr.vmem [resolvable:$true] %s151_s12 }
  0x2b   :  { %v60_v11 = vld [vmem:[#allocation7 + $0x20] sm:$0xff]  ;;  %v61_v12 = vld [vmem:[#allocation7 + $0x28] sm:$0xff]  ;;  %v63_v14 = vsub.f32 %v57_v8, %v51_v2  ;;  %v64_v15 = vsub.f32 %v58_v9, %v52_v3  ;;  %v65_v17 = vsub.f32 %v59_v10, %v53_v4  ;;  %v75_v20 = vmul.f32 %v57_v8, %v57_v8  ;;  %p217_p2 = scmp.ne.s32.totalorder %s142_s10, %s216_s13  ;;  %s220_s14 = scalar_lea.vmem %s142_s10, 32 }
  0x2c   :  { %v66_v18 = vsub.f32 %v60_v11, %v54_v5  ;;  %v67_v19 = vsub.f32 %v61_v12, %v55_v6  ;;  %v68_v21 = vmul.f32 %v62_v13, %v62_v13  ;;  %v76_v24 = vmul.f32 %v58_v9, %v58_v9  ;;  %p221_p3 = scmp.lt.s32.totalorder %s142_s10, %s142_s10  ;;  %p222_p4 = scmp.lt.s32.totalorder %s220_s14, %s216_s13 }
  0x2d   :  { %v69_v22 = vmul.f32 %v63_v14, %v63_v14  ;;  %v70_v23 = vmul.f32 %v64_v15, %v64_v15  ;;  %v71_v25 = vmul.f32 %v65_v17, %v65_v17  ;;  %v77_v30 = vmul.f32 %v59_v10, %v59_v10 }
  0x2e   :  { %v72_v26 = vmul.f32 %v66_v18, %v66_v18  ;;  %v82_v27 = vsel %vm47_vm0, %v68_v21, 0.0  ;;  %v73_v31 = vmul.f32 %v67_v19, %v67_v19  ;;  %v78_v33 = vmul.f32 %v60_v11, %v60_v11  ;;  %p223_p5 = por %p222_p4, %p221_p3 }
  0x2f   :  { %v83_v28 = vsel %vm47_vm0, %v69_v22, 0.0  ;;  %v85_v29 = vsel %vm47_vm0, %v70_v23, 0.0  ;;  %v87_v34 = vsel %vm47_vm0, %v71_v25, 0.0  ;;  %v96_v35 = vsel %vm47_vm0, %v74_v16, 0.0  ;;  %v80_v49 = vld [vmem:[#allocation2] sm:$0xff]  ;;  %v95_v53 = vld [vmem:[#allocation3] sm:$0xff] }
  0x30   :  { %v84_v32 = vadd.f32 %v83_v28, %v82_v27  ;;  %v97_v36 = vsel %vm47_vm0, %v75_v20, 0.0  ;;  %v99_v37 = vsel %vm47_vm0, %v76_v24, 0.0  ;;  %v89_v40 = vsel %vm47_vm0, %v72_v26, 0.0  ;;  %p224_p6 = pnand %p223_p5, %p217_p2 }
  0x31   :  { %v98_v39 = vadd.f32 %v97_v36, %v96_v35  ;;  %v79_v41 = vmul.f32 %v61_v12, %v61_v12  ;;  %v101_v42 = vsel %vm47_vm0, %v77_v30, 0.0  ;;  %v91_v45 = vsel %vm47_vm0, %v73_v31, 0.0 }
  0x32   :  { %v86_v38 = vadd.f32 %v85_v29, %v84_v32  ;;  %v103_v46 = vsel %vm47_vm0, %v78_v33, 0.0 }
  0x33   :  { %v100_v44 = vadd.f32 %v99_v37, %v98_v39  ;;  %v105_v50 = vsel %vm47_vm0, %v79_v41, 0.0 }
  0x34   :  { %v88_v43 = vadd.f32 %v87_v34, %v86_v38 }
  0x35   :  { %v102_v48 = vadd.f32 %v101_v42, %v100_v44 }
  0x36   :  { %v90_v47 = vadd.f32 %v89_v40, %v88_v43 }
  0x37   :  { %v104_v52 = vadd.f32 %v103_v46, %v102_v48 }
  0x38   :  { %v92_v51 = vadd.f32 %v91_v45, %v90_v47 }
  0x39   :  { %v106_v55 = vadd.f32 %v105_v50, %v104_v52 }
  0x3a   :  { %v93_v54 = vadd.f32 %v92_v51, %v80_v49 }
  0x3b   :  { %v107_v56 = vadd.f32 %v106_v55, %v95_v53 }
  0x3c   :  { %94 = vst.msk [vmem:[#allocation2] sm:$0xff] %vm47_vm0, %v93_v54 }
  0x3d   :  { %108 = vst.msk [vmem:[#allocation3] sm:$0xff] %vm47_vm0, %v107_v56 }
  0x43   :  { %v112_v57 = vld [vmem:[#allocation2] sm:$0xff] }
  0x44   :  { %v113_v58 = vsel %vm47_vm0, %v112_v57, 0.0  ;;  %v124_v59 = vld [vmem:[#allocation3] sm:$0xff] }
  0x45   :  { %114 = vadd.xlane.f32.xlu0 %v113_v58  ;;  %v125_v60 = vsel %vm47_vm0, %v124_v59, 0.0 }
  0x49   :  { %126 = vadd.xlane.f32.xlu0 %v125_v60 }
  0xd2   :  { %v115_v61 = vpop.xlane.xlu0 %114 }
  0xd3   :  { %v116_v62 = vrot.slane %v115_v61, 4 }
  0xd5   :  { %v117_v63 = vadd.f32 %v116_v62, %v115_v61 }
  0xd6   :  { %v127_v0 = vpop.xlane.xlu0 %126 }
  0xd7   :  { %v118_v1 = vrot.slane %v117_v63, 2  ;;  %v128_v2 = vrot.slane %v127_v0, 4 }
  0xd9   :  { %v119_v3 = vadd.f32 %v118_v1, %v117_v63  ;;  %v129_v4 = vadd.f32 %v128_v2, %v127_v0 }
  0xdb   :  { %v120_v5 = vrot.slane %v119_v3, 1  ;;  %v130_v6 = vrot.slane %v129_v4, 2 }
  0xdd   :  { %v121_v7 = vadd.f32 %v120_v5, %v119_v3  ;;  %v131_v8 = vadd.f32 %v130_v6, %v129_v4 }
  0xdf   :  { %v132_v9 = vrot.slane %v131_v8, 1  ;;  %123 = vst.msk [vmem:[#allocation9] sm:$0x1] %vm122_vm1, %v121_v7 }
  0xe0   :  { %227 = shalt.err (!%p224_p6)
}
  0xe1   :  { %s228_s17 = scalar_lea.hbm %s365_s2, 16 }
  0xe2   :  { %p229_p7 = scmp.ne.s32.totalorder %s365_s2, %s228_s17  ;;  %p232_p8 = scmp.lt.u32.totalorder %s228_s17, %s365_s2 }
  0xe4   :  { %p234_p9 = pnand %p232_p8, %p229_p7 }
  0xe6   :  { %237 = shalt.err (!%p234_p9)
}
  0xe7   :  { %144 = dma.vmem_to_hbm [thread:$0]  %s142_s10, 16, %s365_s2, [#allocation6]   ;;  %v133_v10 = vadd.f32 %v132_v9, %v131_v8 }
  0xe8   :  { %s238_s24 = scalar_lea.vmem %s152_s12, 16  ;;  %s242_s25 = scalar_lea.vmem %s152_s12, 32 }
  0xe9   :  { %134 = vst.msk [vmem:[#allocation10] sm:$0x1] %vm122_vm1, %v133_v10  ;;  %p239_p10 = scmp.ne.s32.totalorder %s152_s12, %s238_s24  ;;  %p243_p11 = scmp.lt.s32.totalorder %s152_s12, %s152_s12 }
  0xea   :  { %p244_p12 = scmp.lt.s32.totalorder %s242_s25, %s238_s24 }
  0xec   :  { %p245_p13 = por %p244_p12, %p243_p11 }
  0xee   :  { %p246_p0 = pnand %p245_p13, %p239_p10 }
  0xf0   :  { %249 = shalt.err (!%p246_p0)
}
  0xf1   :  { %s250_s28 = scalar_lea.hbm %s366_s3, 16 }
  0xf2   :  { %p251_p1 = scmp.ne.s32.totalorder %s366_s3, %s250_s28  ;;  %p254_p2 = scmp.lt.u32.totalorder %s250_s28, %s366_s3 }
  0xf4   :  { %p256_p3 = pnand %p254_p2, %p251_p1 }
  0xf6   :  { %259 = shalt.err (!%p256_p3)
}
  0xf7   :  { %154 = dma.vmem_to_hbm [thread:$0]  %s152_s12, 16, %s366_s3, [#allocation11]  }
  0xf8   :  { %264 = dma.done.wait [#allocation6], 16  }
  0xf9   :  { %265 = vsyncadd [#allocation6], 4294967280 }
  0xfa   :  { %266 = dma.done.wait [#allocation11], 16  }
  0xfb   :  { %267 = vsyncadd [#allocation11], 4294967280 }
  0xfc   :  { %161 = vsyncpa [#allocation5], 1 }
  0xfd   :  { %162 = vsyncpa [#allocation8], 1 }
  0xfe   :  { %163 = vsyncpa [#allocation6], 1 }
  0xff   :  { %164 = vsyncpa [#allocation11], 1 }

</bundles_post_ra>
